<compile_context>
chip_gen: v7x
topology: tpu7x:2x2x1
jax: 0.10.0
libtpu: 0.0.40
codegen_flags: <defaults>
</compile_context>

<pallas_src>
import functools

import jax
import jax.numpy as jnp
from jax.experimental import pallas as pl
from jax.experimental.pallas import tpu as pltpu

N_LAYERS = 8      # total Linear layers for this config
D = 128           # hidden feature dims zero-padded to this lane-dense width
K_ALIGN = 64      # input-feature lane padding (bf16-packing & MXU friendly)


def _cdiv(a, b):
    return (a + b - 1) // b


def _round_up(x, m):
    return _cdiv(x, m) * m


def qnet_kernel(w0_ref, w_ref, b_ref, x_ref, out_ref):
    """Fused 8-layer MLP for one batch tile.

    w0_ref : (K_pad, D) bf16     -- layer-0 weight, rows >= in_features are zero
    w_ref  : (7, D, D) bf16      -- layers 1..7 weights, zero-padded to (D, D)
    b_ref  : (8, 1, D) f32       -- stacked, zero-padded biases
    x_ref  : (tb, K_pad) bf16    -- activations tile (lanes >= in_features are zero)
    out_ref: (tb, out_features) f32
    """
    # Layer 0: Linear(in_features, b1).  bf16 MXU operands, f32 accumulation.
    h = jnp.dot(x_ref[...], w0_ref[...],
                preferred_element_type=jnp.float32) + b_ref[0]
    # Layers 1..7: ReLU precedes every Linear except the final one.
    for i in range(1, N_LAYERS):
        if i < N_LAYERS - 1:
            h = jnp.maximum(h, 0.0)                      # ReLU in f32 (VPU, v5e-safe)
        h = jnp.dot(h.astype(jnp.bfloat16), w_ref[i - 1],
                    preferred_element_type=jnp.float32) + b_ref[i]
    # Only the first out_features lanes are real; store a lane-narrow block so the
    # HBM writeback is out_features*4 bytes/row instead of a padded 512 B/row.
    out_ref[...] = h[:, :out_ref.shape[-1]].astype(out_ref.dtype)


def pack_params(params, in_features):
    """Pack list of (W:(fan_in,fan_out) f32, b:(fan_out,) f32) into:
       w0     : (round_up(in_features,64), 128) bf16   -- layer 0
       w_rest : (7, 128, 128) bf16                     -- layers 1..7
       b_all  : (8, 1, 128) f32
    All padding is exact zeros, so padded lanes never leak into real outputs
    (zero weights + zero bias, and ReLU(0) == 0)."""
    assert len(params) == N_LAYERS
    k_pad = _round_up(in_features, K_ALIGN)

    w0_f, b0 = params[0]
    fi0, fo0 = w0_f.shape
    assert fi0 == in_features
    w0 = jnp.zeros((k_pad, D), jnp.float32).at[:fi0, :fo0].set(w0_f)

    w_rest = jnp.zeros((N_LAYERS - 1, D, D), jnp.float32)
    b_all = jnp.zeros((N_LAYERS, 1, D), jnp.float32)
    b_all = b_all.at[0, 0, :fo0].set(b0.reshape(-1))
    for i, (w, b) in enumerate(params[1:], start=1):
        fi, fo = w.shape
        w_rest = w_rest.at[i - 1, :fi, :fo].set(w)
        b_all = b_all.at[i, 0, :fo].set(b.reshape(-1))
    return w0.astype(jnp.bfloat16), w_rest.astype(jnp.bfloat16), b_all


@functools.partial(jax.jit, static_argnames=("out_features", "tile_b"))
def linear_qnet_forward(x, w0, w_rest, b_all, *, out_features, tile_b=1024):
    """x: (batch, in_features) f32. Returns (batch, out_features) f32."""
    batch, in_features = x.shape
    k_pad = w0.shape[0]

    # Adaptive batch tiling: at most ~7 junk rows per tile, and >= 2 grid steps for
    # big batches so v7x's two TensorCores both get work on the "parallel" axis.
    n_tiles = max(1, _cdiv(batch, tile_b))
    if batch >= 512:
        n_tiles = max(n_tiles, 2)
    tb = _round_up(_cdiv(batch, n_tiles), 8)
    padded_batch = n_tiles * tb

    # Input DMA'd as bf16, padded only to k_pad (=64) lanes. Numerics-free: the kernel
    # casts activations to bf16 before every matmul anyway.
    x_pad = jnp.zeros((padded_batch, k_pad), jnp.bfloat16)
    x_pad = x_pad.at[:batch, :in_features].set(x.astype(jnp.bfloat16))

    flops = 2 * padded_batch * (k_pad * D + (N_LAYERS - 1) * D * D)
    bytes_accessed = (w0.size * 2 + w_rest.size * 2 + b_all.size * 4
                      + x_pad.size * 2 + padded_batch * out_features * 4)

    out = pl.pallas_call(
        qnet_kernel,
        out_shape=jax.ShapeDtypeStruct((padded_batch, out_features), jnp.float32),
        grid_spec=pltpu.PrefetchScalarGridSpec(
            num_scalar_prefetch=0,
            grid=(n_tiles,),
            in_specs=[
                # Grid-invariant weights/biases: DMA'd once, stay VMEM-resident.
                pl.BlockSpec((k_pad, D), lambda i: (0, 0)),
                pl.BlockSpec((N_LAYERS - 1, D, D), lambda i: (0, 0, 0)),
                pl.BlockSpec((N_LAYERS, 1, D), lambda i: (0, 0, 0)),
                # Activations: tiled over the batch, double-buffered by BlockSpec.
                pl.BlockSpec((tb, k_pad), lambda i: (i, 0)),
            ],
            out_specs=pl.BlockSpec((tb, out_features), lambda i: (i, 0)),
        ),
        compiler_params=pltpu.CompilerParams(
            dimension_semantics=("parallel",),   # batch tiles are independent
            vmem_limit_bytes=32 * 1024 * 1024,   # >> actual use (~1-2 MiB); safe on v5e/v6e/v7x
        ),
        cost_estimate=pl.CostEstimate(
            flops=flops, transcendentals=0, bytes_accessed=bytes_accessed),
    )(w0, w_rest, b_all, x_pad)

    return out[:batch]


def _init_linear(key, fan_in, fan_out):
    # Deterministic init mimicking PyTorch's default U(-1/sqrt(fan_in), 1/sqrt(fan_in)).
    kw, kb = jax.random.split(key)
    bound = 1.0 / jnp.sqrt(jnp.float32(fan_in))
    w = jax.random.uniform(kw, (fan_in, fan_out), jnp.float32, -bound, bound)
    b = jax.random.uniform(kb, (fan_out,), jnp.float32, -bound, bound)
    return w, b


def make_params(key, in_features, b1_nodes, b1_layers, b2_nodes, b2_layers,
                b3_nodes, b3_layers, out_features):
    assert b1_layers == 2 and b2_layers == 1 and b3_layers == 1, \
        "kernel is specialized to the 8-Linear default config"
    dims = [
        (in_features, b1_nodes),
        (b1_nodes, b1_nodes),
        (b1_nodes, b1_nodes),
        (b1_nodes, b2_nodes),
        (b2_nodes, b2_nodes),
        (b2_nodes, b3_nodes),
        (b3_nodes, b3_nodes),
        (b3_nodes, out_features),
    ]
    keys = jax.random.split(key, len(dims))
    return [_init_linear(k, fi, fo) for k, (fi, fo) in zip(keys, dims)]


def reference_forward_f32(x, params):
    """Pure-f32 reference matching the PyTorch module semantics."""
    h = x.astype(jnp.float32)
    n = len(params)
    for i, (w, b) in enumerate(params):
        if 0 < i < n - 1:
            h = jnp.maximum(h, 0.0)
        h = h @ w + b.reshape(1, -1)
    return h


def reference_forward_bf16(x, params):
    """Reference with the same numerics as the kernel (bf16 MXU operands,
    f32 accumulation / bias / ReLU)."""
    h = x.astype(jnp.float32)
    n = len(params)
    for i, (w, b) in enumerate(params):
        if 0 < i < n - 1:
            h = jnp.maximum(h, 0.0)
        h = jnp.dot(h.astype(jnp.bfloat16), w.astype(jnp.bfloat16),
                    preferred_element_type=jnp.float32) + b.reshape(1, -1)
    return h


if __name__ == "__main__":
    key = jax.random.PRNGKey(0)
    k_params, k_x, k_x2 = jax.random.split(key, 3)

    in_features, out_features = 40, 3
    b1_nodes, b1_layers = 128, 2
    b2_nodes, b2_layers = 64, 1
    b3_nodes, b3_layers = 32, 1
    batch = 8

    params = make_params(k_params, in_features, b1_nodes, b1_layers,
                         b2_nodes, b2_layers, b3_nodes, b3_layers, out_features)
    w0, w_rest, b_all = pack_params(params, in_features)

    # --- Small (rollout-style) batch: single grid step. ---
    x = jax.random.normal(k_x, (batch, in_features), jnp.float32)
    y = linear_qnet_forward(x, w0, w_rest, b_all, out_features=out_features)
    y = jax.block_until_ready(y)
    assert y.shape == (batch, out_features)

    y_ref16 = reference_forward_bf16(x, params)
    assert jnp.allclose(y, y_ref16, atol=2e-3, rtol=2e-3), \
        "mismatch vs. bf16-matched reference"
    y_ref32 = reference_forward_f32(x, params)
    assert jnp.allclose(y, y_ref32, atol=2e-1, rtol=2e-1), \
        "mismatch vs. f32 reference beyond bf16 tolerance"

    # --- Multi-tile path: batch not a tile multiple, small tile -> 3 grid steps. ---
    batch2 = 20
    x2 = jax.random.normal(k_x2, (batch2, in_features), jnp.float32)
    y2 = linear_qnet_forward(x2, w0, w_rest, b_all,
                             out_features=out_features, tile_b=8)
    y2 = jax.block_until_ready(y2)
    assert y2.shape == (batch2, out_features)
    y2_ref16 = reference_forward_bf16(x2, params)
    assert jnp.allclose(y2, y2_ref16, atol=2e-3, rtol=2e-3), \
        "multi-tile mismatch vs. bf16-matched reference"

    print("KERNEL_OK")
</pallas_src>

<mosaic_0001>
module attributes {stable_mosaic.version = 11 : i64} {
  func.func @qnet_kernel(%arg0: i32, %arg1: memref<64x128xbf16, #tpu.memory_space<vmem>>, %arg2: memref<7x128x128xbf16, #tpu.memory_space<vmem>>, %arg3: memref<8x1x128xf32, #tpu.memory_space<vmem>>, %arg4: memref<8x64xbf16, #tpu.memory_space<vmem>>, %arg5: memref<8x3xf32, #tpu.memory_space<vmem>>) attributes {dimension_semantics = [#tpu.dimension_semantics<parallel>], iteration_bounds = array<i64: 1>, scalar_prefetch = 0 : i64, scratch_operands = 0 : i64, tpu.core_type = #tpu.core_type<tc>, window_params = [{pipeline_mode = #tpu.pipeline_mode<synchronous>, transform_indices = @transform_0, window_bounds = array<i64: 64, 128>}, {pipeline_mode = #tpu.pipeline_mode<synchronous>, transform_indices = @transform_1, window_bounds = array<i64: 7, 128, 128>}, {pipeline_mode = #tpu.pipeline_mode<synchronous>, transform_indices = @transform_2, window_bounds = array<i64: 8, 1, 128>}, {transform_indices = @transform_3, window_bounds = array<i64: 8, 64>}, {transform_indices = @transform_4, window_bounds = array<i64: 8, 3>}]} {
    %c0 = arith.constant 0 : index
    %c0_0 = arith.constant 0 : index
    %0 = vector.load %arg4[%c0, %c0_0] : memref<8x64xbf16, #tpu.memory_space<vmem>>, vector<8x64xbf16>
    %c0_1 = arith.constant 0 : index
    %c0_2 = arith.constant 0 : index
    %1 = vector.load %arg1[%c0_1, %c0_2] : memref<64x128xbf16, #tpu.memory_space<vmem>>, vector<64x128xbf16>
    %cst = arith.constant dense<0.000000e+00> : vector<8x128xf32>
    %2 = tpu.matmul %0, %1, %cst {dimension_numbers = #tpu.dot_dimension_numbers<[1], [0], [0], [1], [0, 0, 1, 1], [], []>} : vector<8x64xbf16>, vector<64x128xbf16>, vector<8x128xf32> -> vector<8x128xf32>
    %c0_3 = arith.constant 0 : index
    %c0_4 = arith.constant 0 : index
    %c0_5 = arith.constant 0 : index
    %3 = vector.load %arg3[%c0_3, %c0_4, %c0_5] : memref<8x1x128xf32, #tpu.memory_space<vmem>>, vector<1x1x128xf32>
    %4 = vector.shape_cast %3 : vector<1x1x128xf32> to vector<1x128xf32>
    %5 = vector.broadcast %4 : vector<1x128xf32> to vector<8x128xf32>
    %6 = arith.addf %2, %5 : vector<8x128xf32>
    %cst_6 = arith.constant 0.000000e+00 : f32
    %7 = vector.broadcast %cst_6 : f32 to vector<8x128xf32>
    %8 = arith.maximumf %6, %7 : vector<8x128xf32>
    %9 = arith.truncf %8 : vector<8x128xf32> to vector<8x128xbf16>
    %c0_7 = arith.constant 0 : index
    %c0_8 = arith.constant 0 : index
    %c0_9 = arith.constant 0 : index
    %10 = vector.load %arg2[%c0_7, %c0_8, %c0_9] : memref<7x128x128xbf16, #tpu.memory_space<vmem>>, vector<1x128x128xbf16>
    %11 = vector.shape_cast %10 : vector<1x128x128xbf16> to vector<128x128xbf16>
    %cst_10 = arith.constant dense<0.000000e+00> : vector<8x128xf32>
    %12 = tpu.matmul %9, %11, %cst_10 {dimension_numbers = #tpu.dot_dimension_numbers<[1], [0], [0], [1], [0, 0, 1, 1], [], []>} : vector<8x128xbf16>, vector<128x128xbf16>, vector<8x128xf32> -> vector<8x128xf32>
    %c1 = arith.constant 1 : index
    %c0_11 = arith.constant 0 : index
    %c0_12 = arith.constant 0 : index
    %13 = vector.load %arg3[%c1, %c0_11, %c0_12] : memref<8x1x128xf32, #tpu.memory_space<vmem>>, vector<1x1x128xf32>
    %14 = vector.shape_cast %13 : vector<1x1x128xf32> to vector<1x128xf32>
    %15 = vector.broadcast %14 : vector<1x128xf32> to vector<8x128xf32>
    %16 = arith.addf %12, %15 : vector<8x128xf32>
    %cst_13 = arith.constant 0.000000e+00 : f32
    %17 = vector.broadcast %cst_13 : f32 to vector<8x128xf32>
    %18 = arith.maximumf %16, %17 : vector<8x128xf32>
    %19 = arith.truncf %18 : vector<8x128xf32> to vector<8x128xbf16>
    %c1_14 = arith.constant 1 : index
    %c0_15 = arith.constant 0 : index
    %c0_16 = arith.constant 0 : index
    %20 = vector.load %arg2[%c1_14, %c0_15, %c0_16] : memref<7x128x128xbf16, #tpu.memory_space<vmem>>, vector<1x128x128xbf16>
    %21 = vector.shape_cast %20 : vector<1x128x128xbf16> to vector<128x128xbf16>
    %cst_17 = arith.constant dense<0.000000e+00> : vector<8x128xf32>
    %22 = tpu.matmul %19, %21, %cst_17 {dimension_numbers = #tpu.dot_dimension_numbers<[1], [0], [0], [1], [0, 0, 1, 1], [], []>} : vector<8x128xbf16>, vector<128x128xbf16>, vector<8x128xf32> -> vector<8x128xf32>
    %c2 = arith.constant 2 : index
    %c0_18 = arith.constant 0 : index
    %c0_19 = arith.constant 0 : index
    %23 = vector.load %arg3[%c2, %c0_18, %c0_19] : memref<8x1x128xf32, #tpu.memory_space<vmem>>, vector<1x1x128xf32>
    %24 = vector.shape_cast %23 : vector<1x1x128xf32> to vector<1x128xf32>
    %25 = vector.broadcast %24 : vector<1x128xf32> to vector<8x128xf32>
    %26 = arith.addf %22, %25 : vector<8x128xf32>
    %cst_20 = arith.constant 0.000000e+00 : f32
    %27 = vector.broadcast %cst_20 : f32 to vector<8x128xf32>
    %28 = arith.maximumf %26, %27 : vector<8x128xf32>
    %29 = arith.truncf %28 : vector<8x128xf32> to vector<8x128xbf16>
    %c2_21 = arith.constant 2 : index
    %c0_22 = arith.constant 0 : index
    %c0_23 = arith.constant 0 : index
    %30 = vector.load %arg2[%c2_21, %c0_22, %c0_23] : memref<7x128x128xbf16, #tpu.memory_space<vmem>>, vector<1x128x128xbf16>
    %31 = vector.shape_cast %30 : vector<1x128x128xbf16> to vector<128x128xbf16>
    %cst_24 = arith.constant dense<0.000000e+00> : vector<8x128xf32>
    %32 = tpu.matmul %29, %31, %cst_24 {dimension_numbers = #tpu.dot_dimension_numbers<[1], [0], [0], [1], [0, 0, 1, 1], [], []>} : vector<8x128xbf16>, vector<128x128xbf16>, vector<8x128xf32> -> vector<8x128xf32>
    %c3 = arith.constant 3 : index
    %c0_25 = arith.constant 0 : index
    %c0_26 = arith.constant 0 : index
    %33 = vector.load %arg3[%c3, %c0_25, %c0_26] : memref<8x1x128xf32, #tpu.memory_space<vmem>>, vector<1x1x128xf32>
    %34 = vector.shape_cast %33 : vector<1x1x128xf32> to vector<1x128xf32>
    %35 = vector.broadcast %34 : vector<1x128xf32> to vector<8x128xf32>
    %36 = arith.addf %32, %35 : vector<8x128xf32>
    %cst_27 = arith.constant 0.000000e+00 : f32
    %37 = vector.broadcast %cst_27 : f32 to vector<8x128xf32>
    %38 = arith.maximumf %36, %37 : vector<8x128xf32>
    %39 = arith.truncf %38 : vector<8x128xf32> to vector<8x128xbf16>
    %c3_28 = arith.constant 3 : index
    %c0_29 = arith.constant 0 : index
    %c0_30 = arith.constant 0 : index
    %40 = vector.load %arg2[%c3_28, %c0_29, %c0_30] : memref<7x128x128xbf16, #tpu.memory_space<vmem>>, vector<1x128x128xbf16>
    %41 = vector.shape_cast %40 : vector<1x128x128xbf16> to vector<128x128xbf16>
    %cst_31 = arith.constant dense<0.000000e+00> : vector<8x128xf32>
    %42 = tpu.matmul %39, %41, %cst_31 {dimension_numbers = #tpu.dot_dimension_numbers<[1], [0], [0], [1], [0, 0, 1, 1], [], []>} : vector<8x128xbf16>, vector<128x128xbf16>, vector<8x128xf32> -> vector<8x128xf32>
    %c4 = arith.constant 4 : index
    %c0_32 = arith.constant 0 : index
    %c0_33 = arith.constant 0 : index
    %43 = vector.load %arg3[%c4, %c0_32, %c0_33] : memref<8x1x128xf32, #tpu.memory_space<vmem>>, vector<1x1x128xf32>
    %44 = vector.shape_cast %43 : vector<1x1x128xf32> to vector<1x128xf32>
    %45 = vector.broadcast %44 : vector<1x128xf32> to vector<8x128xf32>
    %46 = arith.addf %42, %45 : vector<8x128xf32>
    %cst_34 = arith.constant 0.000000e+00 : f32
    %47 = vector.broadcast %cst_34 : f32 to vector<8x128xf32>
    %48 = arith.maximumf %46, %47 : vector<8x128xf32>
    %49 = arith.truncf %48 : vector<8x128xf32> to vector<8x128xbf16>
    %c4_35 = arith.constant 4 : index
    %c0_36 = arith.constant 0 : index
    %c0_37 = arith.constant 0 : index
    %50 = vector.load %arg2[%c4_35, %c0_36, %c0_37] : memref<7x128x128xbf16, #tpu.memory_space<vmem>>, vector<1x128x128xbf16>
    %51 = vector.shape_cast %50 : vector<1x128x128xbf16> to vector<128x128xbf16>
    %cst_38 = arith.constant dense<0.000000e+00> : vector<8x128xf32>
    %52 = tpu.matmul %49, %51, %cst_38 {dimension_numbers = #tpu.dot_dimension_numbers<[1], [0], [0], [1], [0, 0, 1, 1], [], []>} : vector<8x128xbf16>, vector<128x128xbf16>, vector<8x128xf32> -> vector<8x128xf32>
    %c5 = arith.constant 5 : index
    %c0_39 = arith.constant 0 : index
    %c0_40 = arith.constant 0 : index
    %53 = vector.load %arg3[%c5, %c0_39, %c0_40] : memref<8x1x128xf32, #tpu.memory_space<vmem>>, vector<1x1x128xf32>
    %54 = vector.shape_cast %53 : vector<1x1x128xf32> to vector<1x128xf32>
    %55 = vector.broadcast %54 : vector<1x128xf32> to vector<8x128xf32>
    %56 = arith.addf %52, %55 : vector<8x128xf32>
    %cst_41 = arith.constant 0.000000e+00 : f32
    %57 = vector.broadcast %cst_41 : f32 to vector<8x128xf32>
    %58 = arith.maximumf %56, %57 : vector<8x128xf32>
    %59 = arith.truncf %58 : vector<8x128xf32> to vector<8x128xbf16>
    %c5_42 = arith.constant 5 : index
    %c0_43 = arith.constant 0 : index
    %c0_44 = arith.constant 0 : index
    %60 = vector.load %arg2[%c5_42, %c0_43, %c0_44] : memref<7x128x128xbf16, #tpu.memory_space<vmem>>, vector<1x128x128xbf16>
    %61 = vector.shape_cast %60 : vector<1x128x128xbf16> to vector<128x128xbf16>
    %cst_45 = arith.constant dense<0.000000e+00> : vector<8x128xf32>
    %62 = tpu.matmul %59, %61, %cst_45 {dimension_numbers = #tpu.dot_dimension_numbers<[1], [0], [0], [1], [0, 0, 1, 1], [], []>} : vector<8x128xbf16>, vector<128x128xbf16>, vector<8x128xf32> -> vector<8x128xf32>
    %c6 = arith.constant 6 : index
    %c0_46 = arith.constant 0 : index
    %c0_47 = arith.constant 0 : index
    %63 = vector.load %arg3[%c6, %c0_46, %c0_47] : memref<8x1x128xf32, #tpu.memory_space<vmem>>, vector<1x1x128xf32>
    %64 = vector.shape_cast %63 : vector<1x1x128xf32> to vector<1x128xf32>
    %65 = vector.broadcast %64 : vector<1x128xf32> to vector<8x128xf32>
    %66 = arith.addf %62, %65 : vector<8x128xf32>
    %67 = arith.truncf %66 : vector<8x128xf32> to vector<8x128xbf16>
    %c6_48 = arith.constant 6 : index
    %c0_49 = arith.constant 0 : index
    %c0_50 = arith.constant 0 : index
    %68 = vector.load %arg2[%c6_48, %c0_49, %c0_50] : memref<7x128x128xbf16, #tpu.memory_space<vmem>>, vector<1x128x128xbf16>
    %69 = vector.shape_cast %68 : vector<1x128x128xbf16> to vector<128x128xbf16>
    %cst_51 = arith.constant dense<0.000000e+00> : vector<8x128xf32>
    %70 = tpu.matmul %67, %69, %cst_51 {dimension_numbers = #tpu.dot_dimension_numbers<[1], [0], [0], [1], [0, 0, 1, 1], [], []>} : vector<8x128xbf16>, vector<128x128xbf16>, vector<8x128xf32> -> vector<8x128xf32>
    %c7 = arith.constant 7 : index
    %c0_52 = arith.constant 0 : index
    %c0_53 = arith.constant 0 : index
    %71 = vector.load %arg3[%c7, %c0_52, %c0_53] : memref<8x1x128xf32, #tpu.memory_space<vmem>>, vector<1x1x128xf32>
    %72 = vector.shape_cast %71 : vector<1x1x128xf32> to vector<1x128xf32>
    %73 = vector.broadcast %72 : vector<1x128xf32> to vector<8x128xf32>
    %74 = arith.addf %70, %73 : vector<8x128xf32>
    %75 = vector.extract_strided_slice %74 {offsets = [0, 0], sizes = [8, 3], strides = [1, 1]} : vector<8x128xf32> to vector<8x3xf32>
    %c0_54 = arith.constant 0 : index
    %c0_55 = arith.constant 0 : index
    %76 = vector.load %arg5[%c0_54, %c0_55] : memref<8x3xf32, #tpu.memory_space<vmem>>, vector<8x3xf32>
    tpu.vector_store %arg5[%c0_54, %c0_55], %75 {strides = array<i32>} : memref<8x3xf32, #tpu.memory_space<vmem>>, vector<8x3xf32>,
    return
  }
  func.func @transform_0(%arg0: i32) -> (i32, i32) {
    %c0_i32 = arith.constant 0 : i32
    %c0_i32_0 = arith.constant 0 : i32
    %c0_i32_1 = arith.constant 0 : i32
    return %c0_i32, %c0_i32_0 : i32, i32
  }
  func.func @transform_1(%arg0: i32) -> (i32, i32, i32) {
    %c0_i32 = arith.constant 0 : i32
    %c0_i32_0 = arith.constant 0 : i32
    %c0_i32_1 = arith.constant 0 : i32
    %c0_i32_2 = arith.constant 0 : i32
    return %c0_i32, %c0_i32_0, %c0_i32_1 : i32, i32, i32
  }
  func.func @transform_2(%arg0: i32) -> (i32, i32, i32) {
    %c0_i32 = arith.constant 0 : i32
    %c0_i32_0 = arith.constant 0 : i32
    %c0_i32_1 = arith.constant 0 : i32
    %c0_i32_2 = arith.constant 0 : i32
    return %c0_i32, %c0_i32_0, %c0_i32_1 : i32, i32, i32
  }
  func.func @transform_3(%arg0: i32) -> (i32, i32) {
    %c0_i32 = arith.constant 0 : i32
    %c0_i32_0 = arith.constant 0 : i32
    return %arg0, %c0_i32 : i32, i32
  }
  func.func @transform_4(%arg0: i32) -> (i32, i32) {
    %c0_i32 = arith.constant 0 : i32
    %c0_i32_0 = arith.constant 0 : i32
    return %arg0, %c0_i32 : i32, i32
  }
}

</mosaic_0001>

<bundles_post_ra>
// kernel: linear_qnet_forward.1
= control target key start
LH: loop header
LB: loop body
LE: loop exit
PB: predicated region body
PF: predicated region fallthrough
CT: control target
= control target key end

     0   :  { %9 = vsyncpa [#allocation3], 0  ;;  %s1512_s0 = inlined_call_operand.hbm [shape: bf16[64,128], index: 0, kind: input, shape index: {}]   ;;  %s1513_s1 = inlined_call_operand.hbm [shape: bf16[7,128,128], index: 1, kind: input, shape index: {}]   ;;  %s1514_s2 = inlined_call_operand.vmem [shape: f32[8,1,128], index: 2, kind: input, shape index: {}]   ;;  %s1515_s3 = inlined_call_operand.vmem [shape: bf16[8,64], index: 3, kind: input, shape index: {}]   ;;  %s1516_s4 = inlined_call_operand.vmem [shape: f32[8,3], index: 4, kind: output, shape index: {}]  }
   0x1   :  { %10 = vsyncpa [#allocation5], 0  ;;  %s1351_s15 = smov [#allocation2]   ;;  %s1303_s19 = scalar_lea.hbm %s1512_s0, 512 }
   0x2   :  { %s16_s16 = sshll.u32 %s1351_s15, 4  ;;  %p1304_p0 = scmp.ne.s32.totalorder %s1512_s0, %s1303_s19  ;;  %s17_s16 = int_to_ptr.vmem [resolvable:$true] %s16_s16 }
   0x3   :  { %p1307_p1 = scmp.lt.u32.totalorder %s1303_s19, %s1512_s0 }
   0x5   :  { %p1309_p2 = pnand %p1307_p1, %p1304_p0 }
   0x7   :  { %1312 = shalt.err (!%p1309_p2)
}
   0x8   :  { %s1313_s24 = scalar_lea.vmem %s17_s16, 512  ;;  %p1318_p4 = scmp.lt.s32.totalorder %s17_s16, %s17_s16 }
   0x9   :  { %p1314_p3 = scmp.ne.s32.totalorder %s17_s16, %s1313_s24  ;;  %p1319_p5 = scmp.lt.s32.totalorder %s1313_s24, %s1313_s24 }
   0xb   :  { %p1320_p6 = por %p1319_p5, %p1318_p4 }
   0xd   :  { %p1321_p7 = pnand %p1320_p6, %p1314_p3 }
   0xf   :  { %1324 = shalt.err (!%p1321_p7)
}
  0x10   :  { %s1352_s25 = smov 64   ;;  %s1353_s26 = smov 4  }
  0x11   :  { %22 = dma.hbm_to_vmem [thread:$0]  %s1512_s0, 512, %s17_s16, [#allocation3], %s1352_s25, %s1352_s25, %s1353_s26  }
  0x12   :  { %s1354_s29 = smov [#allocation4]   ;;  %s1325_s7 = scalar_lea.hbm %s1513_s1, 7168 }
  0x13   :  { %s28_s30 = sshll.u32 %s1354_s29, 4  ;;  %p1326_p8 = scmp.ne.s32.totalorder %s1513_s1, %s1325_s7  ;;  %s29_s30 = int_to_ptr.vmem [resolvable:$true] %s28_s30 }
  0x14   :  { %p1329_p9 = scmp.lt.u32.totalorder %s1325_s7, %s1513_s1 }
  0x16   :  { %p1331_p10 = pnand %p1329_p9, %p1326_p8 }
  0x18   :  { %1334 = shalt.err (!%p1331_p10)
}
  0x19   :  { %s1335_s12 = scalar_lea.vmem %s29_s30, 7168  ;;  %p1340_p12 = scmp.lt.s32.totalorder %s29_s30, %s29_s30 }
  0x1a   :  { %p1336_p11 = scmp.ne.s32.totalorder %s29_s30, %s1335_s12  ;;  %p1341_p13 = scmp.lt.s32.totalorder %s1335_s12, %s1335_s12 }
  0x1c   :  { %p1342_p0 = por %p1341_p13, %p1340_p12 }
  0x1e   :  { %p1343_p1 = pnand %p1342_p0, %p1336_p11 }
  0x20   :  { %1346 = shalt.err (!%p1343_p1)
}
  0x21   :  { %34 = dma.hbm_to_vmem [thread:$0]  %s1513_s1, 7168, %s29_s30, [#allocation5], %s1352_s25, %s1352_s25, %s1353_s26  }
  0x22   :  { %1347 = dma.done.wait [#allocation3], 512  }
  0x23   :  { %1348 = vsyncadd [#allocation3], 4294966784 }
  0x24   :  { %1349 = dma.done.wait [#allocation5], 7168  }
  0x25   :  { %1350 = vsyncadd [#allocation5], 4294960128  ;;  %v1355_v0 = vmov 0.0   ;;  %vm1356_vm0 = vmmov 0   ;;  %v1243_v1 = vld [vmem:[#allocation2] sm:$0xff]   ;;  %v1244_v2 = vld [vmem:[#allocation2 + $0x8] sm:$0xff]  }
  0x26   :  { %1085 = vmatprep.subr.bf16.mxu0 %v1355_v0  ;;  %1093 = vmatprep.mubr.msk.bf16.mxu0 %vm1356_vm0, %v1355_v0  ;;  %v1247_v3 = vld [vmem:[#allocation4] sm:$0xff]   ;;  %v1245_v4 = vld [vmem:[#allocation2 + $0x10] sm:$0xff]   ;;  %v1248_v5 = vld [vmem:[#allocation4 + $0x8] sm:$0xff]   ;;  %vm86_vm1 = vcmask 523264   ;;  %vm933_vm2 = vcmask 23552  }
  0x27   :  { %1097 = vmatprep.subr.bf16.mxu1 %v1355_v0  ;;  %1113 = vmatprep.mubr.msk.bf16.mxu1 %vm1356_vm0, %v1355_v0  ;;  %v1246_v6 = vld [vmem:[#allocation2 + $0x18] sm:$0xff]   ;;  %v1249_v7 = vld [vmem:[#allocation4 + $0x10] sm:$0xff]   ;;  %v46_v8 = vld [vmem:[%s1515_s3] sm:$0xf] }
  0x28   :  { %1086 = vmatpush3.bf16.msra.mxu0 %v1243_v1  ;;  %1098 = vmatpush3.bf16.msra.mxu1 %v1247_v3  ;;  %v1250_v9 = vld [vmem:[#allocation4 + $0x18] sm:$0xff]   ;;  %v1251_v10 = vld [vmem:[#allocation4 + $0x20] sm:$0xff]   ;;  %v1252_v11 = vld [vmem:[#allocation4 + $0x28] sm:$0xff]  }
  0x29   :  { %1087 = vmatprep.subr.bf16.mxu0 %v1355_v0  ;;  %1099 = vmatprep.subr.bf16.mxu1 %v1355_v0  ;;  %v1253_v12 = vld [vmem:[#allocation4 + $0x30] sm:$0xff]   ;;  %v1254_v13 = vld [vmem:[#allocation4 + $0x38] sm:$0xff]   ;;  %v1255_v14 = vld [vmem:[#allocation4 + $0x40] sm:$0xff]  }
  0x2a   :  { %v1256_v15 = vld [vmem:[#allocation4 + $0x48] sm:$0xff]   ;;  %v1257_v16 = vld [vmem:[#allocation4 + $0x50] sm:$0xff]   ;;  %v1258_v17 = vld [vmem:[#allocation4 + $0x58] sm:$0xff]  }
  0x2b   :  { %v1259_v18 = vld [vmem:[#allocation4 + $0x60] sm:$0xff]   ;;  %v1260_v19 = vld [vmem:[#allocation4 + $0x68] sm:$0xff]   ;;  %v1261_v28 = vld [vmem:[#allocation4 + $0x70] sm:$0xff]  }
  0x2c   :  { %1088 = vmatpush3.bf16.msra.mxu0 %v1244_v2  ;;  %1100 = vmatpush3.bf16.msra.mxu1 %v1248_v5  ;;  %v941_v20 = vld [vmem:[%s1514_s2] ss:$0 sm:$0xff]  ;;  %v1262_v29 = vld [vmem:[#allocation4 + $0x78] sm:$0xff]   ;;  %v1264_v31 = vld [vmem:[#allocation4 + $0x88] sm:$0xff]  }
  0x2d   :  { %1089 = vmatprep.subr.bf16.mxu0 %v1355_v0  ;;  %1101 = vmatprep.subr.bf16.mxu1 %v1355_v0  ;;  %v1263_v30 = vld [vmem:[#allocation4 + $0x80] sm:$0xff]   ;;  %v1265_v32 = vld [vmem:[#allocation4 + $0x90] sm:$0xff]   ;;  %v1266_v33 = vld [vmem:[#allocation4 + $0x98] sm:$0xff]  }
  0x2e   :  { %v1267_v34 = vld [vmem:[#allocation4 + $0xa0] sm:$0xff]   ;;  %v1268_v35 = vld [vmem:[#allocation4 + $0xa8] sm:$0xff]   ;;  %v1269_v44 = vld [vmem:[#allocation4 + $0xb0] sm:$0xff]  }
  0x2f   :  { %v948_v36 = vld [vmem:[%s1514_s2 + $0x1] ss:$0 sm:$0xff]  ;;  %v1270_v45 = vld [vmem:[#allocation4 + $0xb8] sm:$0xff]   ;;  %v1272_v47 = vld [vmem:[#allocation4 + $0xc8] sm:$0xff]  }
  0x30   :  { %1090 = vmatpush3.bf16.msra.mxu0 %v1245_v4  ;;  %1102 = vmatpush3.bf16.msra.mxu1 %v1249_v7  ;;  %v1271_v46 = vld [vmem:[#allocation4 + $0xc0] sm:$0xff]   ;;  %v1273_v48 = vld [vmem:[#allocation4 + $0xd0] sm:$0xff]   ;;  %v1274_v49 = vld [vmem:[#allocation4 + $0xd8] sm:$0xff]  }
  0x31   :  { %1091 = vmatprep.subr.bf16.mxu0 %v1355_v0  ;;  %1103 = vmatprep.subr.bf16.mxu1 %v1355_v0  ;;  %v1275_v50 = vld [vmem:[#allocation4 + $0xe0] sm:$0xff]   ;;  %v1276_v51 = vld [vmem:[#allocation4 + $0xe8] sm:$0xff]   ;;  %v1277_v60 = vld [vmem:[#allocation4 + $0xf0] sm:$0xff]  }
  0x32   :  { %v958_v52 = vld [vmem:[%s1514_s2 + $0x2] ss:$0 sm:$0xff]  ;;  %v1278_v61 = vld [vmem:[#allocation4 + $0xf8] sm:$0xff]   ;;  %v1280_v63 = vld [vmem:[#allocation4 + $0x108] sm:$0xff]  }
  0x33   :  { %v1279_v62 = vld [vmem:[#allocation4 + $0x100] sm:$0xff]   ;;  %v1281_v1 = vld [vmem:[#allocation4 + $0x110] sm:$0xff]   ;;  %v1282_v2 = vld [vmem:[#allocation4 + $0x118] sm:$0xff]  }
  0x34   :  { %1092 = vmatpush3.bf16.msra.mxu0 %v1246_v6  ;;  %1104 = vmatpush3.bf16.msra.mxu1 %v1250_v9  ;;  %v1283_v3 = vld [vmem:[#allocation4 + $0x120] sm:$0xff]   ;;  %v1284_v4 = vld [vmem:[#allocation4 + $0x128] sm:$0xff]  }
  0x35   :  { %1117 = vmatprep.subr.bf16.mxu0 %v1355_v0  ;;  %1105 = vmatprep.subr.bf16.mxu1 %v1355_v0  ;;  %v968_v5 = vld [vmem:[%s1514_s2 + $0x3] ss:$0 sm:$0xff] }
  0x37   :  { %1094 = vmatmul.mubr.msk.bf16.vlgmr.msra.gmra.mrb[0].mxu0 %vm86_vm1, %v46_v8 }
  0x38   :  { %1133 = vmatprep.mubr.msk.bf16.mxu0 %vm1356_vm0, %v1355_v0  ;;  %1106 = vmatpush3.bf16.msra.mxu1 %v1251_v10 }
  0x39   :  { %1107 = vmatprep.subr.bf16.mxu1 %v1355_v0  ;;  %1118 = vmatpush3.bf16.msra.mxu0 %v1255_v14  ;;  %v1286_v14 = vld [vmem:[#allocation4 + $0x138] sm:$0xff]  }
  0x3a   :  { %1119 = vmatprep.subr.bf16.mxu0 %v1355_v0 }
  0x3c   :  { %1108 = vmatpush3.bf16.msra.mxu1 %v1252_v11 }
  0x3d   :  { %1109 = vmatprep.subr.bf16.mxu1 %v1355_v0  ;;  %1120 = vmatpush3.bf16.msra.mxu0 %v1256_v15  ;;  %v1287_v15 = vld [vmem:[#allocation4 + $0x140] sm:$0xff]  }
  0x3e   :  { %1121 = vmatprep.subr.bf16.mxu0 %v1355_v0 }
  0x40   :  { %1110 = vmatpush3.bf16.msra.mxu1 %v1253_v12 }
  0x41   :  { %1111 = vmatprep.subr.bf16.mxu1 %v1355_v0  ;;  %1122 = vmatpush3.bf16.msra.mxu0 %v1257_v16  ;;  %v1288_v16 = vld [vmem:[#allocation4 + $0x148] sm:$0xff]  }
  0x42   :  { %1123 = vmatprep.subr.bf16.mxu0 %v1355_v0 }
  0x44   :  { %1112 = vmatpush3.bf16.msra.mxu1 %v1254_v13  ;;  %v1285_v13 = vld [vmem:[#allocation4 + $0x130] sm:$0xff]  }
  0x45   :  { %1137 = vmatprep.subr.bf16.mxu1 %v1355_v0  ;;  %1124 = vmatpush3.bf16.msra.mxu0 %v1258_v17  ;;  %v1289_v17 = vld [vmem:[#allocation4 + $0x150] sm:$0xff]  }
  0x46   :  { %1125 = vmatprep.subr.bf16.mxu0 %v1355_v0 }
  0x49   :  { %1126 = vmatpush3.bf16.msra.mxu0 %v1259_v18  ;;  %v1290_v18 = vld [vmem:[#allocation4 + $0x158] sm:$0xff]  }
  0x4a   :  { %1127 = vmatprep.subr.bf16.mxu0 %v1355_v0 }
  0x4d   :  { %1128 = vmatpush3.bf16.msra.mxu0 %v1260_v19  ;;  %v1291_v19 = vld [vmem:[#allocation4 + $0x160] sm:$0xff]  }
  0x4e   :  { %1129 = vmatprep.subr.bf16.mxu0 %v1355_v0 }
  0x51   :  { %1130 = vmatpush3.bf16.msra.mxu0 %v1261_v28 }
  0x52   :  { %1131 = vmatprep.subr.bf16.mxu0 %v1355_v0 }
  0x55   :  { %1132 = vmatpush3.bf16.msra.mxu0 %v1262_v29  ;;  %v1293_v29 = vld [vmem:[#allocation4 + $0x170] sm:$0xff]  }
  0x56   :  { %1157 = vmatprep.subr.bf16.mxu0 %v1355_v0 }
 0x10a   :  { %v124_v21 = vpop.f32.mrb[0].mxu0 }
 0x10b   :  { %v125_v22 = vadd.f32 %v941_v20, %v124_v21  ;;  %v1095_v23 = vpop.f32.mrb[1].mxu0  ;;  %v1292_v20 = vld [vmem:[#allocation4 + $0x168] sm:$0xff]   ;;  %v978_v21 = vld [vmem:[%s1514_s2 + $0x4] ss:$0 sm:$0xff] }
 0x10c   :  { %v127_v24 = vpop.f32.mrb[2].mxu0 }
 0x10d   :  { %v130_v25 = vmax.f32 %v125_v22, 0.0  ;;  %v1096_v26 = vpop.f32.mrb[3].mxu0 }
 0x10f   :  { %v131_v27 = vpack.c.bf16 %v130_v25, %v130_v25 }
 0x111   :  { %1114 = vmatmul.mubr.bf16.vlgmr.msra.gmra.mrb[0].mxu1 %v131_v27 }
 0x112   :  { %1153 = vmatprep.mubr.msk.bf16.mxu1 %vm1356_vm0, %v1355_v0  ;;  %1138 = vmatpush3.bf16.msra.mxu1 %v1263_v30  ;;  %v1294_v30 = vld [vmem:[#allocation4 + $0x178] sm:$0xff]  }
 0x113   :  { %1139 = vmatprep.subr.bf16.mxu1 %v1355_v0 }
 0x116   :  { %1140 = vmatpush3.bf16.msra.mxu1 %v1264_v31  ;;  %v1295_v31 = vld [vmem:[#allocation4 + $0x180] sm:$0xff]  }
 0x117   :  { %1141 = vmatprep.subr.bf16.mxu1 %v1355_v0 }
 0x11a   :  { %1142 = vmatpush3.bf16.msra.mxu1 %v1265_v32  ;;  %v1296_v32 = vld [vmem:[#allocation4 + $0x188] sm:$0xff]  }
 0x11b   :  { %1143 = vmatprep.subr.bf16.mxu1 %v1355_v0 }
 0x11e   :  { %1144 = vmatpush3.bf16.msra.mxu1 %v1266_v33  ;;  %v1297_v33 = vld [vmem:[#allocation4 + $0x190] sm:$0xff]  }
 0x11f   :  { %1145 = vmatprep.subr.bf16.mxu1 %v1355_v0 }
 0x122   :  { %1146 = vmatpush3.bf16.msra.mxu1 %v1267_v34  ;;  %v1298_v34 = vld [vmem:[#allocation4 + $0x198] sm:$0xff]  }
 0x123   :  { %1147 = vmatprep.subr.bf16.mxu1 %v1355_v0 }
 0x126   :  { %1148 = vmatpush3.bf16.msra.mxu1 %v1268_v35  ;;  %v1299_v35 = vld [vmem:[#allocation4 + $0x1a0] sm:$0xff]  }
 0x127   :  { %1149 = vmatprep.subr.bf16.mxu1 %v1355_v0 }
 0x12a   :  { %1150 = vmatpush3.bf16.msra.mxu1 %v1269_v44 }
 0x12b   :  { %1151 = vmatprep.subr.bf16.mxu1 %v1355_v0 }
 0x12e   :  { %1152 = vmatpush3.bf16.msra.mxu1 %v1270_v45 }
 0x12f   :  { %1177 = vmatprep.subr.bf16.mxu1 %v1355_v0 }
 0x1e4   :  { %v238_v37 = vpop.f32.mrb[0].mxu1 }
 0x1e5   :  { %v239_v38 = vadd.f32 %v948_v36, %v238_v37  ;;  %v1115_v39 = vpop.f32.mrb[1].mxu1  ;;  %v1300_v36 = vld [vmem:[#allocation4 + $0x1a8] sm:$0xff]   ;;  %v1301_v37 = vld [vmem:[#allocation4 + $0x1b0] sm:$0xff]  }
 0x1e6   :  { %v241_v40 = vpop.f32.mrb[2].mxu1 }
 0x1e7   :  { %v244_v41 = vmax.f32 %v239_v38, 0.0  ;;  %v1116_v42 = vpop.f32.mrb[3].mxu1  ;;  %v988_v38 = vld [vmem:[%s1514_s2 + $0x5] ss:$0 sm:$0xff] }
 0x1e9   :  { %v245_v43 = vpack.c.bf16 %v244_v41, %v244_v41 }
 0x1eb   :  { %1134 = vmatmul.mubr.bf16.vlgmr.msra.gmra.mrb[4].mxu0 %v245_v43 }
 0x1ec   :  { %1173 = vmatprep.mubr.msk.bf16.mxu0 %vm1356_vm0, %v1355_v0  ;;  %1158 = vmatpush3.bf16.msra.mxu0 %v1271_v46  ;;  %v1302_v46 = vld [vmem:[#allocation4 + $0x1b8] sm:$0xff]  }
 0x1ed   :  { %1159 = vmatprep.subr.bf16.mxu0 %v1355_v0 }
 0x1f0   :  { %1160 = vmatpush3.bf16.msra.mxu0 %v1272_v47  ;;  %v998_v47 = vld [vmem:[%s1514_s2 + $0x6] ss:$0 sm:$0xff] }
 0x1f1   :  { %1161 = vmatprep.subr.bf16.mxu0 %v1355_v0 }
 0x1f4   :  { %1162 = vmatpush3.bf16.msra.mxu0 %v1273_v48 }
 0x1f5   :  { %1163 = vmatprep.subr.bf16.mxu0 %v1355_v0 }
 0x1f8   :  { %1164 = vmatpush3.bf16.msra.mxu0 %v1274_v49 }
 0x1f9   :  { %1165 = vmatprep.subr.bf16.mxu0 %v1355_v0 }
 0x1fc   :  { %1166 = vmatpush3.bf16.msra.mxu0 %v1275_v50 }
 0x1fd   :  { %1167 = vmatprep.subr.bf16.mxu0 %v1355_v0 }
 0x200   :  { %1168 = vmatpush3.bf16.msra.mxu0 %v1276_v51 }
 0x201   :  { %1169 = vmatprep.subr.bf16.mxu0 %v1355_v0 }
 0x204   :  { %1170 = vmatpush3.bf16.msra.mxu0 %v1277_v60 }
 0x205   :  { %1171 = vmatprep.subr.bf16.mxu0 %v1355_v0 }
 0x208   :  { %1172 = vmatpush3.bf16.msra.mxu0 %v1278_v61 }
 0x209   :  { %1197 = vmatprep.subr.bf16.mxu0 %v1355_v0 }
 0x2be   :  { %v353_v53 = vpop.f32.mrb[4].mxu0 }
 0x2bf   :  { %v354_v54 = vadd.f32 %v958_v52, %v353_v53  ;;  %v1135_v55 = vpop.f32.mrb[5].mxu0  ;;  %v1008_v53 = vld [vmem:[%s1514_s2 + $0x7] ss:$0 sm:$0xff] }
 0x2c0   :  { %v356_v56 = vpop.f32.mrb[6].mxu0 }
 0x2c1   :  { %v359_v57 = vmax.f32 %v354_v54, 0.0  ;;  %v1136_v58 = vpop.f32.mrb[7].mxu0 }
 0x2c3   :  { %v360_v59 = vpack.c.bf16 %v359_v57, %v359_v57 }
 0x2c5   :  { %1154 = vmatmul.mubr.bf16.vlgmr.msra.gmra.mrb[4].mxu1 %v360_v59 }
 0x2c6   :  { %1193 = vmatprep.mubr.msk.bf16.mxu1 %vm1356_vm0, %v1355_v0  ;;  %1178 = vmatpush3.bf16.msra.mxu1 %v1279_v62 }
 0x2c7   :  { %1179 = vmatprep.subr.bf16.mxu1 %v1355_v0 }
 0x2ca   :  { %1180 = vmatpush3.bf16.msra.mxu1 %v1280_v63 }
 0x2cb   :  { %1181 = vmatprep.subr.bf16.mxu1 %v1355_v0 }
 0x2ce   :  { %1182 = vmatpush3.bf16.msra.mxu1 %v1281_v1 }
 0x2cf   :  { %1183 = vmatprep.subr.bf16.mxu1 %v1355_v0 }
 0x2d2   :  { %1184 = vmatpush3.bf16.msra.mxu1 %v1282_v2 }
 0x2d3   :  { %1185 = vmatprep.subr.bf16.mxu1 %v1355_v0 }
 0x2d6   :  { %1186 = vmatpush3.bf16.msra.mxu1 %v1283_v3 }
 0x2d7   :  { %1187 = vmatprep.subr.bf16.mxu1 %v1355_v0 }
 0x2da   :  { %1188 = vmatpush3.bf16.msra.mxu1 %v1284_v4 }
 0x2db   :  { %1189 = vmatprep.subr.bf16.mxu1 %v1355_v0 }
 0x2de   :  { %1190 = vmatpush3.bf16.msra.mxu1 %v1285_v13 }
 0x2df   :  { %1191 = vmatprep.subr.bf16.mxu1 %v1355_v0 }
 0x2e2   :  { %1192 = vmatpush3.bf16.msra.mxu1 %v1286_v14 }
 0x2e3   :  { %1217 = vmatprep.subr.bf16.mxu1 %v1355_v0 }
 0x398   :  { %v468_v6 = vpop.f32.mrb[4].mxu1 }
 0x399   :  { %v469_v7 = vadd.f32 %v968_v5, %v468_v6  ;;  %v1155_v8 = vpop.f32.mrb[5].mxu1 }
 0x39a   :  { %v471_v9 = vpop.f32.mrb[6].mxu1 }
 0x39b   :  { %v474_v10 = vmax.f32 %v469_v7, 0.0  ;;  %v1156_v11 = vpop.f32.mrb[7].mxu1 }
 0x39d   :  { %v475_v12 = vpack.c.bf16 %v474_v10, %v474_v10 }
 0x39f   :  { %1174 = vmatmul.mubr.bf16.vlgmr.msra.gmra.mrb[8].mxu0 %v475_v12 }
 0x3a0   :  { %1213 = vmatprep.mubr.msk.bf16.mxu0 %vm1356_vm0, %v1355_v0  ;;  %1198 = vmatpush3.bf16.msra.mxu0 %v1287_v15 }
 0x3a1   :  { %1199 = vmatprep.subr.bf16.mxu0 %v1355_v0 }
 0x3a4   :  { %1200 = vmatpush3.bf16.msra.mxu0 %v1288_v16 }
 0x3a5   :  { %1201 = vmatprep.subr.bf16.mxu0 %v1355_v0 }
 0x3a8   :  { %1202 = vmatpush3.bf16.msra.mxu0 %v1289_v17 }
 0x3a9   :  { %1203 = vmatprep.subr.bf16.mxu0 %v1355_v0 }
 0x3ac   :  { %1204 = vmatpush3.bf16.msra.mxu0 %v1290_v18 }
 0x3ad   :  { %1205 = vmatprep.subr.bf16.mxu0 %v1355_v0 }
 0x3b0   :  { %1206 = vmatpush3.bf16.msra.mxu0 %v1291_v19 }
 0x3b1   :  { %1207 = vmatprep.subr.bf16.mxu0 %v1355_v0 }
 0x3b4   :  { %1208 = vmatpush3.bf16.msra.mxu0 %v1292_v20 }
 0x3b5   :  { %1209 = vmatprep.subr.bf16.mxu0 %v1355_v0 }
 0x3b8   :  { %1210 = vmatpush3.bf16.msra.mxu0 %v1293_v29 }
 0x3b9   :  { %1211 = vmatprep.subr.bf16.mxu0 %v1355_v0 }
 0x3bc   :  { %1212 = vmatpush3.bf16.msra.mxu0 %v1294_v30 }
 0x472   :  { %v583_v22 = vpop.f32.mrb[8].mxu0 }
 0x473   :  { %v584_v23 = vadd.f32 %v978_v21, %v583_v22  ;;  %v1175_v24 = vpop.f32.mrb[9].mxu0 }
 0x474   :  { %v586_v25 = vpop.f32.mrb[10].mxu0 }
 0x475   :  { %v589_v26 = vmax.f32 %v584_v23, 0.0  ;;  %v1176_v27 = vpop.f32.mrb[11].mxu0 }
 0x477   :  { %v590_v28 = vpack.c.bf16 %v589_v26, %v589_v26 }
 0x479   :  { %1194 = vmatmul.mubr.bf16.vlgmr.msra.gmra.mrb[8].mxu1 %v590_v28 }
 0x47a   :  { %1233 = vmatprep.mubr.msk.bf16.mxu1 %vm1356_vm0, %v1355_v0  ;;  %1218 = vmatpush3.bf16.msra.mxu1 %v1295_v31 }
 0x47b   :  { %1219 = vmatprep.subr.bf16.mxu1 %v1355_v0 }
 0x47e   :  { %1220 = vmatpush3.bf16.msra.mxu1 %v1296_v32 }
 0x47f   :  { %1221 = vmatprep.subr.bf16.mxu1 %v1355_v0 }
 0x482   :  { %1222 = vmatpush3.bf16.msra.mxu1 %v1297_v33 }
 0x483   :  { %1223 = vmatprep.subr.bf16.mxu1 %v1355_v0 }
 0x486   :  { %1224 = vmatpush3.bf16.msra.mxu1 %v1298_v34 }
 0x487   :  { %1225 = vmatprep.subr.bf16.mxu1 %v1355_v0 }
 0x48a   :  { %1226 = vmatpush3.bf16.msra.mxu1 %v1299_v35 }
 0x48b   :  { %1227 = vmatprep.subr.bf16.mxu1 %v1355_v0 }
 0x48e   :  { %1228 = vmatpush3.bf16.msra.mxu1 %v1300_v36 }
 0x48f   :  { %1229 = vmatprep.subr.bf16.mxu1 %v1355_v0 }
 0x492   :  { %1230 = vmatpush3.bf16.msra.mxu1 %v1301_v37 }
 0x493   :  { %1231 = vmatprep.subr.bf16.mxu1 %v1355_v0 }
 0x496   :  { %1232 = vmatpush3.bf16.msra.mxu1 %v1302_v46 }
 0x54c   :  { %v698_v39 = vpop.f32.mrb[8].mxu1 }
 0x54d   :  { %v699_v40 = vadd.f32 %v988_v38, %v698_v39  ;;  %v1195_v41 = vpop.f32.mrb[9].mxu1 }
 0x54e   :  { %v701_v42 = vpop.f32.mrb[10].mxu1 }
 0x54f   :  { %v704_v43 = vmax.f32 %v699_v40, 0.0  ;;  %v1196_v44 = vpop.f32.mrb[11].mxu1 }
 0x551   :  { %v705_v45 = vpack.c.bf16 %v704_v43, %v704_v43 }
 0x553   :  { %1214 = vmatmul.mubr.bf16.vlgmr.msra.gmra.mrb[12].mxu0 %v705_v45 }
 0x626   :  { %v813_v48 = vpop.f32.mrb[12].mxu0 }
 0x627   :  { %v814_v0 = vadd.f32 %v998_v47, %v813_v48  ;;  %v1215_v49 = vpop.f32.mrb[13].mxu0 }
 0x628   :  { %v816_v50 = vpop.f32.mrb[14].mxu0 }
 0x629   :  { %v819_v51 = vpack.c.bf16 %v814_v0, %v814_v0  ;;  %v1216_v52 = vpop.f32.mrb[15].mxu0 }
 0x62b   :  { %1234 = vmatmul.mubr.bf16.vlgmr.msra.gmra.mrb[12].mxu1 %v819_v51 }
 0x6fe   :  { %v927_v54 = vpop.f32.mrb[12].mxu1 }
 0x6ff   :  { %v928_v55 = vadd.f32 %v1008_v53, %v927_v54  ;;  %v1235_v56 = vpop.f32.mrb[13].mxu1 }
 0x700   :  { %v930_v57 = vpop.f32.mrb[14].mxu1 }
 0x701   :  { %934 = vst.msk [vmem:[%s1516_s4] sm:$0xff] %vm933_vm2, %v928_v55  ;;  %v1236_v58 = vpop.f32.mrb[15].mxu1 }
 0x702   :  { %939 = vsyncpa [#allocation3], 1 }
 0x703   :  { %940 = vsyncpa [#allocation5], 1 }

</bundles_post_ra>
